<compile_context>
chip_gen: v5e
topology: v5e:2x2
jax: 0.10.0
libtpu: 0.0.40
codegen_flags: <defaults>
</compile_context>

<pallas_src>
import math
import functools

import jax
import jax.numpy as jnp
from jax import lax
from jax.experimental import pallas as pl
from jax.experimental.pallas import tpu as pltpu


def _round_up(a, b):
    return (a + b - 1) // b * b


def _pick_class_tile(classnum, tn_max, lane=128):
    """Largest multiple of 128 (<= tn_max) that minimizes dead class padding."""
    tn_cap = max(lane, min(_round_up(tn_max, lane), _round_up(classnum, lane)))
    best_t = lane
    best_pad = _round_up(classnum, lane) - classnum
    t = lane
    while t <= tn_cap:
        pad = _round_up(classnum, t) - classnum
        if pad <= best_pad:  # ties -> larger tile (fewer grid steps)
            best_pad, best_t = pad, t
        t += lane
    return best_t


def _vmem_capacity_bytes(default=64 * 1024 * 1024):
    try:
        info = pltpu.get_tpu_info()
        cap = getattr(info, "vmem_capacity_bytes", None)
        if cap:
            return int(cap)
    except Exception:
        pass
    return default  # conservative (v7x-sized) fallback


# --------------------------------------------------------------------------------------
# Kernel: logits tile = clip( (xn @ w.T) * col_scale, -scale, scale )
#   xn_ref : (bm, D)  bf16, rows already L2-normalized (hoisted to the wrapper)
#   w_ref  : (tn, D)  bf16 raw weight rows (class tile)
#   cs_ref : (1, tn)  f32  per-class scale = scale / max(||w_row||, eps)   (exact, f32)
# --------------------------------------------------------------------------------------
def _fc_logits_kernel(xn_ref, w_ref, cs_ref, out_ref, *, scale):
    # Contract on the last dim of both operands: no transpose of the (tn, D) tile.
    dots = lax.dot_general(
        xn_ref[...], w_ref[...],
        dimension_numbers=(((1,), (1,)), ((), ())),
        preferred_element_type=jnp.float32,          # (bm, tn) f32 MXU accumulation
    )
    logits = dots * cs_ref[...]                      # post-matmul column scale (f32)
    # clip(cos,-1,1)*scale == clip(cos*scale,-scale,scale) for scale > 0
    out_ref[...] = jnp.clip(logits, -scale, scale).astype(out_ref.dtype)


# --------------------------------------------------------------------------------------
# One-time weight preparation (do NOT call per step): bf16 cast + pad + exact f32
# per-class norm folded with `scale` into a (1, c_pad) column-scale vector.
# --------------------------------------------------------------------------------------
def prepare_fc_weight(weight, scale, *, tn=512, eps=1e-12):
    C, D = weight.shape
    tn_eff = _pick_class_tile(C, tn)
    c_pad = _round_up(C, tn_eff)

    w32 = weight.astype(jnp.float32)
    inv_norm = lax.rsqrt(jnp.maximum(jnp.sum(w32 * w32, axis=1), eps * eps))
    col_scale = (float(scale) * inv_norm).reshape(1, C).astype(jnp.float32)

    w_bf16 = weight.astype(jnp.bfloat16)
    if c_pad != C:
        w_bf16 = jnp.pad(w_bf16, ((0, c_pad - C), (0, 0)))       # zero rows -> dot == 0
        col_scale = jnp.pad(col_scale, ((0, 0), (0, c_pad - C)))  # zero scale -> 0 logits
    return w_bf16, col_scale, tn_eff


def cosine_scaled_logits(x, w_bf16, col_scale, scale, *, tn_eff,
                         bm=512, eps=1e-12, out_dtype=jnp.float32):
    """clamp(normalize(x) @ normalize(W).T, -1, 1) * scale  as a (B, C_pad) array."""
    B, D = x.shape
    c_pad, D2 = w_bf16.shape
    assert D == D2 and c_pad % tn_eff == 0

    # ---- hoisted x normalization (identical for every class tile) -------------------
    x32 = x.astype(jnp.float32)
    x_inv = lax.rsqrt(jnp.maximum(jnp.sum(x32 * x32, axis=-1, keepdims=True), eps * eps))
    xn = (x32 * x_inv).astype(jnp.bfloat16)

    # ---- batch tiling: multiple of 16 (bf16 sublane packing); single tile when small -
    bm_eff = min(bm, _round_up(B, 16))
    b_pad = _round_up(B, bm_eff)
    if b_pad != B:
        xn = jnp.pad(xn, ((0, b_pad - B), (0, 0)))

    # Class tiles OUTER, batch tiles INNER: weight-tile block index is constant over the
    # inner axis so each bf16 weight tile is DMA'd from HBM exactly once.
    grid = (c_pad // tn_eff, b_pad // bm_eff)

    # VMEM budget: double-buffered bf16 x tile + bf16 w tile + f32 col-scale + out tile.
    out_bytes = jnp.dtype(out_dtype).itemsize
    est = 2 * (bm_eff * D * 2 + tn_eff * D * 2 + tn_eff * 4 + bm_eff * tn_eff * out_bytes)
    cap = _vmem_capacity_bytes()                       # 64 MiB on v7x, 128 MiB on v5e/v6e
    vmem_limit = int(min(max(2 * est, 32 << 20), max(32 << 20, int(cap * 0.8))))

    kernel = functools.partial(_fc_logits_kernel, scale=float(scale))
    out = pl.pallas_call(
        kernel,
        out_shape=jax.ShapeDtypeStruct((b_pad, c_pad), out_dtype),
        grid_spec=pltpu.PrefetchScalarGridSpec(
            num_scalar_prefetch=0,
            grid=grid,
            in_specs=[
                pl.BlockSpec((bm_eff, D), lambda j, i: (i, 0)),      # x batch tile
                pl.BlockSpec((tn_eff, D), lambda j, i: (j, 0)),      # weight class tile
                pl.BlockSpec((1, tn_eff), lambda j, i: (0, j)),      # per-class scale
            ],
            out_specs=pl.BlockSpec((bm_eff, tn_eff), lambda j, i: (i, j)),
        ),
        compiler_params=pltpu.CompilerParams(
            dimension_semantics=("parallel", "parallel"),            # megacore-splittable
            vmem_limit_bytes=vmem_limit,
        ),
    )(xn, w_bf16, col_scale)

    if b_pad != B:
        out = out[:B]
    return out


class Args:
    def __init__(self, classnum, in_feats, margin, scale,
                 fc_mode="arcface", easy_margin=False):
        self.classnum = classnum
        self.in_feats = in_feats
        self.margin = margin
        self.scale = scale
        self.fc_mode = fc_mode
        self.easy_margin = easy_margin


def init_weight(key, classnum, in_feats):
    # nn.init.xavier_uniform_ on a (classnum, in_feats) parameter:
    # fan_in = in_feats, fan_out = classnum, bound = sqrt(6 / (fan_in + fan_out))
    bound = math.sqrt(6.0 / (in_feats + classnum))
    return jax.random.uniform(key, (classnum, in_feats), jnp.float32, -bound, bound)


def fully_connected_forward(x, label, prepared_weight, args, *, out_dtype=jnp.float32):
    w_bf16, col_scale, tn_eff = prepared_weight
    cos_m = math.cos(args.margin)
    sin_m = math.sin(args.margin)
    remain = math.sin(math.pi - args.margin) * args.margin
    thresh = math.cos(math.pi - args.margin)

    # Hot path (normalize / matmul / clamp / scale) in the Pallas kernel.
    logits_pad = cosine_scaled_logits(x, w_bf16, col_scale, args.scale,
                                      tn_eff=tn_eff, out_dtype=out_dtype)
    logits = logits_pad[:, : args.classnum]

    # ---- margin score (DEAD CODE in the reference: the non-inplace scatter result is
    # discarded, so `score` never reaches the output).  Kept only for semantic parity.
    cos_theta = logits.astype(jnp.float32) * (1.0 / args.scale)
    cosin_simi = jnp.take_along_axis(cos_theta, label[:, None], axis=1)

    if args.fc_mode == "arcface":
        sin_theta = jnp.sqrt(jnp.maximum(1.0 - jnp.square(cosin_simi), 0.0))
        cos_theta_m = cosin_simi * cos_m - sin_theta * sin_m
        if args.easy_margin:
            score = jnp.where(cosin_simi > 0, cos_theta_m, cosin_simi)
        else:
            score = jnp.where(cosin_simi > thresh, cos_theta_m, cosin_simi - remain)
    elif args.fc_mode == "cosface":
        if args.easy_margin:
            score = jnp.where(cosin_simi > 0, cosin_simi - args.margin, cosin_simi)
        else:
            score = cosin_simi - args.margin
    elif args.fc_mode == "softmax":
        score = cosin_simi
    else:
        raise Exception("unknown fc type!")
    # TODO(synk): 'sphereface'/'mvcos'/'mvarc'/'curface' branches carry python-side
    # mutable state (iter / factor_t) and in-place masked writes; not implemented here.
    del score  # reference discards the non-inplace scatter; output is cos_theta * scale

    return logits


if __name__ == "__main__":
    B, D, C = 8, 64, 256
    args = Args(classnum=C, in_feats=D, margin=0.5, scale=64.0,
                fc_mode="arcface", easy_margin=False)

    key = jax.random.PRNGKey(0)
    kx, kw, kl = jax.random.split(key, 3)
    x = jax.random.normal(kx, (B, D), jnp.float32)
    weight = init_weight(kw, C, D)
    label = jax.random.randint(kl, (B,), 0, C, jnp.int32)

    # One-time weight prep (bf16 cast + pad + exact f32 per-class norm*scale vector).
    prepared = prepare_fc_weight(weight, args.scale)

    out = fully_connected_forward(x, label, prepared, args)
    out = jax.block_until_ready(out)

    # Pure-JAX f32 reference; tolerance loosened because the kernel matmul runs in bf16
    # (scale=64 amplifies bf16 rounding).
    xn = x / jnp.maximum(jnp.linalg.norm(x, axis=1, keepdims=True), 1e-12)
    wn = weight / jnp.maximum(jnp.linalg.norm(weight, axis=1, keepdims=True), 1e-12)
    ref = jnp.clip(xn @ wn.T, -1.0, 1.0) * args.scale

    assert out.shape == (B, C)
    assert jnp.allclose(out, ref, atol=0.5, rtol=1e-2), float(jnp.max(jnp.abs(out - ref)))

    print("KERNEL_OK")
</pallas_src>

<mosaic_0001>
module attributes {stable_mosaic.version = 11 : i64} {
  func.func @_fc_logits_kernel(%arg0: i32, %arg1: i32, %arg2: memref<16x64xbf16, #tpu.memory_space<vmem>>, %arg3: memref<256x64xbf16, #tpu.memory_space<vmem>>, %arg4: memref<1x256xf32, #tpu.memory_space<vmem>>, %arg5: memref<16x256xf32, #tpu.memory_space<vmem>>) attributes {dimension_semantics = [#tpu.dimension_semantics<parallel>, #tpu.dimension_semantics<parallel>], iteration_bounds = array<i64: 1, 1>, scalar_prefetch = 0 : i64, scratch_operands = 0 : i64, tpu.core_type = #tpu.core_type<tc>, window_params = [{transform_indices = @transform_0, window_bounds = array<i64: 16, 64>}, {transform_indices = @transform_1, window_bounds = array<i64: 256, 64>}, {transform_indices = @transform_2, window_bounds = array<i64: 1, 256>}, {transform_indices = @transform_3, window_bounds = array<i64: 16, 256>}]} {
    %c0 = arith.constant 0 : index
    %c0_0 = arith.constant 0 : index
    %0 = vector.load %arg2[%c0, %c0_0] : memref<16x64xbf16, #tpu.memory_space<vmem>>, vector<16x64xbf16>
    %c0_1 = arith.constant 0 : index
    %c0_2 = arith.constant 0 : index
    %1 = vector.load %arg3[%c0_1, %c0_2] : memref<256x64xbf16, #tpu.memory_space<vmem>>, vector<256x64xbf16>
    %cst = arith.constant dense<0.000000e+00> : vector<16x256xf32>
    %2 = tpu.matmul %0, %1, %cst {dimension_numbers = #tpu.dot_dimension_numbers<[1], [1], [0], [0], [0, 0, 1, 0], [], []>} : vector<16x64xbf16>, vector<256x64xbf16>, vector<16x256xf32> -> vector<16x256xf32>
    %c0_3 = arith.constant 0 : index
    %c0_4 = arith.constant 0 : index
    %3 = vector.load %arg4[%c0_3, %c0_4] : memref<1x256xf32, #tpu.memory_space<vmem>>, vector<1x256xf32>
    %4 = vector.broadcast %3 : vector<1x256xf32> to vector<16x256xf32>
    %5 = arith.mulf %2, %4 : vector<16x256xf32>
    %cst_5 = arith.constant -6.400000e+01 : f32
    %cst_6 = arith.constant 6.400000e+01 : f32
    %6 = vector.broadcast %cst_5 : f32 to vector<16x256xf32>
    %7 = arith.maximumf %6, %5 : vector<16x256xf32>
    %8 = vector.broadcast %cst_6 : f32 to vector<16x256xf32>
    %9 = arith.minimumf %8, %7 : vector<16x256xf32>
    %c0_7 = arith.constant 0 : index
    %c0_8 = arith.constant 0 : index
    %10 = vector.load %arg5[%c0_7, %c0_8] : memref<16x256xf32, #tpu.memory_space<vmem>>, vector<16x256xf32>
    tpu.vector_store %arg5[%c0_7, %c0_8], %9 {strides = array<i32>} : memref<16x256xf32, #tpu.memory_space<vmem>>, vector<16x256xf32>,
    return
  }
  func.func @transform_0(%arg0: i32, %arg1: i32) -> (i32, i32) {
    %c0_i32 = arith.constant 0 : i32
    %c0_i32_0 = arith.constant 0 : i32
    return %arg1, %c0_i32 : i32, i32
  }
  func.func @transform_1(%arg0: i32, %arg1: i32) -> (i32, i32) {
    %c0_i32 = arith.constant 0 : i32
    %c0_i32_0 = arith.constant 0 : i32
    return %arg0, %c0_i32 : i32, i32
  }
  func.func @transform_2(%arg0: i32, %arg1: i32) -> (i32, i32) {
    %c0_i32 = arith.constant 0 : i32
    %c0_i32_0 = arith.constant 0 : i32
    return %c0_i32, %arg0 : i32, i32
  }
  func.func @transform_3(%arg0: i32, %arg1: i32) -> (i32, i32) {
    %c0_i32 = arith.constant 0 : i32
    return %arg1, %arg0 : i32, i32
  }
}

</mosaic_0001>

<bundles_post_ra>
// kernel: tpu_custom_call.1
= control target key start
LH: loop header
LB: loop body
LE: loop exit
PB: predicated region body
PF: predicated region fallthrough
CT: control target
= control target key end

     0   :  { %vm134_vm0 = vcmask 523264   ;;  %s472_s0 = inlined_call_operand.vmem [shape: bf16[16,64], index: 0, kind: input, shape index: {}]   ;;  %s473_s1 = inlined_call_operand.vmem [shape: bf16[256,64], index: 1, kind: input, shape index: {}]   ;;  %s474_s2 = inlined_call_operand.vmem [shape: f32[1,256], index: 2, kind: input, shape index: {}]   ;;  %s475_s3 = inlined_call_operand.hbm [shape: f32[16,256], index: 3, kind: output, shape index: {}]  }
   0x1   :  { %v336_v0 = vld [vmem:[%s473_s1 + $0x38] sm:$0xff]  ;;  %v335_v4 = vld [vmem:[%s473_s1 + $0x30] sm:$0xff] }
   0x2   :  { %v344_v1 = vld [vmem:[%s473_s1 + $0x78] sm:$0xff]  ;;  %v160_v2 = vsel %vm134_vm0, %v336_v0, 0  ;;  %v343_v5 = vld [vmem:[%s473_s1 + $0x70] sm:$0xff] }
   0x3   :  { %v184_v3 = vsel %vm134_vm0, %v344_v1, 0  ;;  %186 = vmatpush.bf16.xpose.msra.mxu0 %v160_v2 }
   0x4   :  { %200 = vmatpush.bf16.xpose.msra.mxu1 %v184_v3 }
   0x5   :  { %8 = vsyncpa [#allocation3], 0  ;;  %v157_v6 = vsel %vm134_vm0, %v335_v4, 0  ;;  %v181_v7 = vsel %vm134_vm0, %v343_v5, 0  ;;  %v334_v8 = vld [vmem:[%s473_s1 + $0x28] sm:$0xff]  ;;  %v333_v12 = vld [vmem:[%s473_s1 + $0x20] sm:$0xff] }
   0x6   :  { %v342_v9 = vld [vmem:[%s473_s1 + $0x68] sm:$0xff]  ;;  %v154_v10 = vsel %vm134_vm0, %v334_v8, 0  ;;  %v341_v13 = vld [vmem:[%s473_s1 + $0x60] sm:$0xff]  ;;  %v151_v14 = vsel %vm134_vm0, %v333_v12, 0  ;;  %v332_v16 = vld [vmem:[%s473_s1 + $0x18] sm:$0xff]  ;;  %s242_s23 = sshll.u32 %s475_s3, 4  ;;  %s243_s23 = int_to_ptr.hbm [resolvable:$true] %s242_s23 }
   0x7   :  { %v178_v11 = vsel %vm134_vm0, %v342_v9, 0  ;;  %v175_v15 = vsel %vm134_vm0, %v341_v13, 0  ;;  %v340_v17 = vld [vmem:[%s473_s1 + $0x58] sm:$0xff]  ;;  %v148_v18 = vsel %vm134_vm0, %v332_v16, 0  ;;  %v331_v20 = vld [vmem:[%s473_s1 + $0x10] sm:$0xff]  ;;  %v330_v24 = vld [vmem:[%s473_s1 + $0x8] sm:$0xff] }
   0x8   :  { %v172_v19 = vsel %vm134_vm0, %v340_v17, 0  ;;  %v339_v21 = vld [vmem:[%s473_s1 + $0x50] sm:$0xff]  ;;  %v145_v22 = vsel %vm134_vm0, %v331_v20, 0  ;;  %v338_v25 = vld [vmem:[%s473_s1 + $0x48] sm:$0xff]  ;;  %v142_v26 = vsel %vm134_vm0, %v330_v24, 0  ;;  %v329_v28 = vld [vmem:[%s473_s1] sm:$0xff] }
   0x9   :  { %v169_v23 = vsel %vm134_vm0, %v339_v21, 0  ;;  %v166_v27 = vsel %vm134_vm0, %v338_v25, 0  ;;  %v337_v29 = vld [vmem:[%s473_s1 + $0x40] sm:$0xff]  ;;  %v139_v30 = vsel %vm134_vm0, %v329_v28, 0  ;;  %s376_s24 = smov 16  }
   0xa   :  { %v163_v31 = vsel %vm134_vm0, %v337_v29, 0  ;;  %v328_v32 = vld [vmem:[%s472_s0] sm:$0xff]  ;;  %s374_s0 = smov [#allocation2]  }
   0xb   :  { %187 = vmatpush.bf16.xpose.msra.mxu0 %v157_v6  ;;  %v214_v33 = vld [vmem:[%s474_s2] sm:$0x3]  ;;  %s240_s1 = sshll.u32 %s374_s0, 4  ;;  %s375_s2 = smov 256   ;;  %s241_s1 = int_to_ptr.vmem [resolvable:$true] %s240_s1 }
   0xc   :  { %201 = vmatpush.bf16.xpose.msra.mxu1 %v181_v7  ;;  %v216_v34 = vperm.slane %v214_v33, 0  ;;  %v217_v35 = vperm.slane %v214_v33, 1 }
  0x13   :  { %188 = vmatpush.bf16.xpose.msra.mxu0 %v154_v10 }
  0x14   :  { %202 = vmatpush.bf16.xpose.msra.mxu1 %v178_v11 }
  0x1b   :  { %189 = vmatpush.bf16.xpose.msra.mxu0 %v151_v14 }
  0x1c   :  { %203 = vmatpush.bf16.xpose.msra.mxu1 %v175_v15 }
  0x23   :  { %190 = vmatpush.bf16.xpose.msra.mxu0 %v148_v18 }
  0x24   :  { %204 = vmatpush.bf16.xpose.msra.mxu1 %v172_v19 }
  0x2b   :  { %191 = vmatpush.bf16.xpose.msra.mxu0 %v145_v22 }
  0x2c   :  { %205 = vmatpush.bf16.xpose.msra.mxu1 %v169_v23 }
  0x33   :  { %192 = vmatpush.bf16.xpose.msra.mxu0 %v142_v26 }
  0x34   :  { %206 = vmatpush.bf16.xpose.msra.mxu1 %v166_v27 }
  0x3b   :  { %193 = vmatpush.bf16.xpose.msra.mxu0 %v139_v30 }
  0x3c   :  { %207 = vmatpush.bf16.xpose.msra.mxu1 %v163_v31 }
  0x42   :  { %322 = vmatmul.msk.bf16.vlgmr.msra.gmra.mxu0 %vm134_vm0, %v328_v32 }
  0x43   :  { %323 = vmatmul.msk.bf16.vlgmr.msra.gmra.mxu1 %vm134_vm0, %v328_v32 }
  0xbf   :  { %v195_v36 = vpop.f32.mrf.mxu0 }
  0xc0   :  { %v209_v37 = vpop.f32.mrf.mxu1  ;;  %v220_v38 = vmul.f32 %v216_v34, %v195_v36 }
  0xc1   :  { %v221_v39 = vmul.f32 %v217_v35, %v209_v37 }
  0xc2   :  { %v324_v40 = vclamps-f32 %v220_v38, 64.0 }
  0xc3   :  { %v325_v41 = vclamps-f32 %v221_v39, 64.0 }
  0xc4   :  { %232 = vst [vmem:[#allocation2] sm:$0xff] %v324_v40 }
  0xc5   :  { %233 = vst [vmem:[#allocation2 + $0x8] sm:$0xff] %v325_v41 }
  0xc7   :  { %v197_v42 = vpop.f32.mrf.mxu0 }
  0xc8   :  { %v211_v43 = vpop.f32.mrf.mxu1  ;;  %v222_v44 = vmul.f32 %v216_v34, %v197_v42 }
  0xc9   :  { %v223_v45 = vmul.f32 %v217_v35, %v211_v43 }
  0xca   :  { %v326_v46 = vclamps-f32 %v222_v44, 64.0 }
  0xcb   :  { %v327_v47 = vclamps-f32 %v223_v45, 64.0 }
  0xcc   :  { %234 = vst [vmem:[#allocation2 + $0x10] sm:$0xff] %v326_v46 }
  0xcd   :  { %235 = vst [vmem:[#allocation2 + $0x18] sm:$0xff] %v327_v47 }
  0xce   :  { %248 = dma.vmem_to_hbm [thread:$0]  %s241_s1, 512, %s243_s23, [#allocation3], %s375_s2, %s375_s2, %s376_s24  }
  0xcf   :  { %372 = dma.done.wait [#allocation3], 512  }
  0xd0   :  { %373 = vsyncadd [#allocation3], 4294966784 }
  0xd1   :  { %253 = vsyncpa [#allocation3], 1 }

</bundles_post_ra>
